<compile_context>
chip_gen: v7x
topology: tpu7x:2x2x1
jax: 0.10.0
libtpu: 0.0.40
codegen_flags: <defaults>
</compile_context>

<pallas_src>
import math

import jax
import jax.numpy as jnp
from jax.experimental import pallas as pl
from jax.experimental.pallas import tpu as pltpu

DIM = 32
UBATCH = 16                 # mirrors the PyTorch module's microbatch size
MAX_SAMPLES_PER_BLOCK = 16384


def _round_up(x, m):
    return ((x + m - 1) // m) * m


def _chip_config():
    """Per-chip packing factor G (MXU edge / 32), VMEM budget and TC count."""
    try:
        kind = jax.devices()[0].device_kind.lower()
    except Exception:
        kind = ""
    if "v7" in kind:                      # 256x256 MXU, 64 MiB VMEM, 2 TCs
        g, vmem_limit, two_tc = 8, 36 << 20, True
    elif "v6" in kind:                    # 256x256 MXU, 128 MiB VMEM, 1 TC
        g, vmem_limit, two_tc = 8, 64 << 20, False
    elif "v5" in kind or "v4" in kind:    # 128x128 MXU, 128 MiB VMEM, 1 TC
        g, vmem_limit, two_tc = 4, 64 << 20, False
    else:                                 # unknown: conservative
        g, vmem_limit, two_tc = 8, 32 << 20, False

    # VMEM per packed row: double-buffered f32 input block + ~5 live f32
    # (bp, G*32) temporaries + double-buffered (bp, G) f32 output block.
    per_row = (2 * 4 + 5 * 4) * (g * DIM) + 2 * 4 * g
    # Fixed: the 4 block-diag hidden weights (bf16, counted double-buffered)
    # plus slack for w5/biases/compiler scratch.
    fixed = 4 * (g * DIM) * (g * DIM) * 2 * 2 + (2 << 20)
    max_rows = (vmem_limit - fixed) // per_row
    max_rows = max(8, min(MAX_SAMPLES_PER_BLOCK // g, max_rows // 8 * 8))
    return dict(g=g, vmem_limit=vmem_limit, two_tc=two_tc, max_rows=max_rows)


def _plan_blocks(c_rows, max_rows, two_tc):
    """Row-block size (multiple of 8 sublanes), grid steps, padded row count.

    Single-TC chips (v5e/v6e): fewest, largest blocks.
    v7x (2 TCs): even step count >= 2 so both cores get balanced work under
    dimension_semantics=("parallel",).
    """
    if two_tc:
        steps = max(2, 2 * ((c_rows + 2 * max_rows - 1) // (2 * max_rows)))
    else:
        steps = max(1, (c_rows + max_rows - 1) // max_rows)
    bp = _round_up((c_rows + steps - 1) // steps, 8)
    return bp, steps, steps * bp


def mlp_kernel(x_ref, w_ref, b_ref, w5_ref, b5_ref, o_ref):
    # x_ref : (bp, G*32) f32  -- G samples packed per row (row-major reshape)
    # w_ref : (4, G*32, G*32) bf16 -- kron(I_G, W_j^T), block-diagonal
    # b_ref : (4, 1, G*32) f32
    # w5_ref: (G*32, G) bf16 -- kron(I_G, w5^T)
    # b5_ref: (1, G) f32
    # o_ref : (bp, G) f32
    h = x_ref[...]                                         # carried in f32
    for j in range(w_ref.shape[0]):                        # 4x Linear+ReLU, unrolled
        z = jnp.dot(h.astype(w_ref.dtype), w_ref[j],
                    preferred_element_type=jnp.float32)    # MXU, f32 accum
        h = jnp.maximum(z + b_ref[j], 0.0)                 # bias+ReLU in f32 (VPU)
    y = jnp.dot(h.astype(w5_ref.dtype), w5_ref[...],
                preferred_element_type=jnp.float32)        # (bp, G)
    o_ref[...] = y + b5_ref[...]


def mlp_forward(x, packed_params, cfg=None):
    """x: (N, DIM) f32.  Returns (N, 1) f32."""
    cfg = cfg or _chip_config()
    g = cfg["g"]
    w_stack, b_stack, w5_blk, b5_blk = packed_params
    n, dim = x.shape
    assert w_stack.shape[-1] == g * dim, (w_stack.shape, g, dim)

    # Pack G samples per row.  (N, dim) -> (C, G*dim) is a pure row-major
    # reshape -- no transpose, no extra HBM pass.
    c = -(-n // g)
    bp, steps, c_pad = _plan_blocks(c, cfg["max_rows"], cfg["two_tc"])
    n_pad = c_pad * g
    if n_pad != n:
        x = jnp.pad(x, ((0, n_pad - n), (0, 0)))           # zero tail, sliced later
    xp = x.reshape(c_pad, g * dim)

    out = pl.pallas_call(
        mlp_kernel,
        out_shape=jax.ShapeDtypeStruct((c_pad, g), jnp.float32),
        grid_spec=pltpu.PrefetchScalarGridSpec(
            num_scalar_prefetch=0,
            grid=(steps,),
            in_specs=[
                pl.BlockSpec((bp, g * dim), lambda i: (i, 0)),      # x block
                pl.BlockSpec(w_stack.shape, lambda i: (0, 0, 0)),   # W1..W4 (resident)
                pl.BlockSpec(b_stack.shape, lambda i: (0, 0, 0)),   # b1..b4
                pl.BlockSpec(w5_blk.shape, lambda i: (0, 0)),       # W5 block-diag
                pl.BlockSpec(b5_blk.shape, lambda i: (0, 0)),       # b5 tiled
            ],
            out_specs=pl.BlockSpec((bp, g), lambda i: (i, 0)),
        ),
        compiler_params=pltpu.CompilerParams(
            dimension_semantics=("parallel",),
            vmem_limit_bytes=cfg["vmem_limit"]),
    )(xp, w_stack, b_stack, w5_blk, b5_blk)

    # Row r holds samples r*G .. r*G+G-1, so a flat reshape restores order.
    return out.reshape(n_pad, 1)[:n]


def init_linear(key, fan_in, fan_out):
    """PyTorch-style Linear init; W in native (out, in) form, b as (out,)."""
    kw, kb = jax.random.split(key)
    bound = 1.0 / math.sqrt(fan_in)
    w = jax.random.uniform(kw, (fan_out, fan_in), jnp.float32, -bound, bound)
    b = jax.random.uniform(kb, (fan_out,), jnp.float32, -bound, bound)
    return w, b


def pack_params(params, g, compute_dtype=jnp.bfloat16):
    """Block-diagonal (kron) packing of the weights for G-sample batching."""
    (w1, b1), (w2, b2), (w3, b3), (w4, b4), (w5, b5) = params
    eye = jnp.eye(g, dtype=jnp.float32)

    def blockdiag_t(w):           # (out, in) -> kron(I_G, w^T): (G*in, G*out)
        return jnp.kron(eye, w.T)

    w_stack = jnp.stack([blockdiag_t(w) for w in (w1, w2, w3, w4)]
                        ).astype(compute_dtype)                       # (4, G*32, G*32)
    b_stack = jnp.stack([jnp.tile(b, (g,)) for b in (b1, b2, b3, b4)]
                        )[:, None, :].astype(jnp.float32)             # (4, 1, G*32)
    w5_blk = blockdiag_t(w5).astype(compute_dtype)                    # (G*32, G)
    b5_blk = jnp.tile(b5, (g,))[None, :].astype(jnp.float32)          # (1, G)
    return w_stack, b_stack, w5_blk, b5_blk


def reference_forward(x, params):
    h = x
    for w, b in params[:4]:
        h = jnp.maximum(h @ w.T + b, 0.0)
    w5, b5 = params[4]
    return h @ w5.T + b5


if __name__ == "__main__":
    key = jax.random.PRNGKey(0)
    kx, k1, k2, k3, k4, k5 = jax.random.split(key, 6)

    n = 2 * UBATCH  # 2 microbatches, like the pipeline loop
    x = jax.random.normal(kx, (n, DIM), jnp.float32)

    params = (
        init_linear(k1, DIM, DIM),  # seq1 linear 0
        init_linear(k2, DIM, DIM),  # seq1 linear 1
        init_linear(k3, DIM, DIM),  # seq2 linear 0
        init_linear(k4, DIM, DIM),  # seq2 linear 1
        init_linear(k5, DIM, 1),    # seq2 linear 2 (dim -> 1)
    )

    cfg = _chip_config()
    packed = pack_params(params, cfg["g"], compute_dtype=jnp.bfloat16)

    out = jax.block_until_ready(mlp_forward(x, packed, cfg))
    ref = reference_forward(x, params)

    assert out.shape == (n, 1), out.shape
    # bf16 MXU operands (f32 accumulation / f32 carried activations) vs f32 ref.
    assert jnp.allclose(out, ref, atol=3e-2, rtol=3e-2), \
        float(jnp.max(jnp.abs(out - ref)))

    print("KERNEL_OK")
</pallas_src>

<mosaic_0001>
module attributes {stable_mosaic.version = 11 : i64} {
  func.func @mlp_kernel(%arg0: i32, %arg1: memref<8x256xf32, #tpu.memory_space<vmem>>, %arg2: memref<4x256x256xbf16, #tpu.memory_space<vmem>>, %arg3: memref<4x1x256xf32, #tpu.memory_space<vmem>>, %arg4: memref<256x8xbf16, #tpu.memory_space<vmem>>, %arg5: memref<1x8xf32, #tpu.memory_space<vmem>>, %arg6: memref<8x8xf32, #tpu.memory_space<vmem>>) attributes {dimension_semantics = [#tpu.dimension_semantics<parallel>], iteration_bounds = array<i64: 1>, scalar_prefetch = 0 : i64, scratch_operands = 0 : i64, tpu.core_type = #tpu.core_type<tc>, window_params = [{transform_indices = @transform_0, window_bounds = array<i64: 8, 256>}, {pipeline_mode = #tpu.pipeline_mode<synchronous>, transform_indices = @transform_1, window_bounds = array<i64: 4, 256, 256>}, {pipeline_mode = #tpu.pipeline_mode<synchronous>, transform_indices = @transform_2, window_bounds = array<i64: 4, 1, 256>}, {pipeline_mode = #tpu.pipeline_mode<synchronous>, transform_indices = @transform_3, window_bounds = array<i64: 256, 8>}, {pipeline_mode = #tpu.pipeline_mode<synchronous>, transform_indices = @transform_4, window_bounds = array<i64: 1, 8>}, {transform_indices = @transform_5, window_bounds = array<i64: 8, 8>}]} {
    %c0 = arith.constant 0 : index
    %c0_0 = arith.constant 0 : index
    %0 = vector.load %arg1[%c0, %c0_0] : memref<8x256xf32, #tpu.memory_space<vmem>>, vector<8x256xf32>
    %1 = arith.truncf %0 : vector<8x256xf32> to vector<8x256xbf16>
    %c0_1 = arith.constant 0 : index
    %c0_2 = arith.constant 0 : index
    %c0_3 = arith.constant 0 : index
    %2 = vector.load %arg2[%c0_1, %c0_2, %c0_3] : memref<4x256x256xbf16, #tpu.memory_space<vmem>>, vector<1x256x256xbf16>
    %3 = vector.shape_cast %2 : vector<1x256x256xbf16> to vector<256x256xbf16>
    %cst = arith.constant dense<0.000000e+00> : vector<8x256xf32>
    %4 = tpu.matmul %1, %3, %cst {dimension_numbers = #tpu.dot_dimension_numbers<[1], [0], [0], [1], [0, 0, 1, 1], [], []>} : vector<8x256xbf16>, vector<256x256xbf16>, vector<8x256xf32> -> vector<8x256xf32>
    %c0_4 = arith.constant 0 : index
    %c0_5 = arith.constant 0 : index
    %c0_6 = arith.constant 0 : index
    %5 = vector.load %arg3[%c0_4, %c0_5, %c0_6] : memref<4x1x256xf32, #tpu.memory_space<vmem>>, vector<1x1x256xf32>
    %6 = vector.shape_cast %5 : vector<1x1x256xf32> to vector<1x256xf32>
    %7 = vector.broadcast %6 : vector<1x256xf32> to vector<8x256xf32>
    %8 = arith.addf %4, %7 : vector<8x256xf32>
    %cst_7 = arith.constant 0.000000e+00 : f32
    %9 = vector.broadcast %cst_7 : f32 to vector<8x256xf32>
    %10 = arith.maximumf %8, %9 : vector<8x256xf32>
    %11 = arith.truncf %10 : vector<8x256xf32> to vector<8x256xbf16>
    %c1 = arith.constant 1 : index
    %c0_8 = arith.constant 0 : index
    %c0_9 = arith.constant 0 : index
    %12 = vector.load %arg2[%c1, %c0_8, %c0_9] : memref<4x256x256xbf16, #tpu.memory_space<vmem>>, vector<1x256x256xbf16>
    %13 = vector.shape_cast %12 : vector<1x256x256xbf16> to vector<256x256xbf16>
    %cst_10 = arith.constant dense<0.000000e+00> : vector<8x256xf32>
    %14 = tpu.matmul %11, %13, %cst_10 {dimension_numbers = #tpu.dot_dimension_numbers<[1], [0], [0], [1], [0, 0, 1, 1], [], []>} : vector<8x256xbf16>, vector<256x256xbf16>, vector<8x256xf32> -> vector<8x256xf32>
    %c1_11 = arith.constant 1 : index
    %c0_12 = arith.constant 0 : index
    %c0_13 = arith.constant 0 : index
    %15 = vector.load %arg3[%c1_11, %c0_12, %c0_13] : memref<4x1x256xf32, #tpu.memory_space<vmem>>, vector<1x1x256xf32>
    %16 = vector.shape_cast %15 : vector<1x1x256xf32> to vector<1x256xf32>
    %17 = vector.broadcast %16 : vector<1x256xf32> to vector<8x256xf32>
    %18 = arith.addf %14, %17 : vector<8x256xf32>
    %cst_14 = arith.constant 0.000000e+00 : f32
    %19 = vector.broadcast %cst_14 : f32 to vector<8x256xf32>
    %20 = arith.maximumf %18, %19 : vector<8x256xf32>
    %21 = arith.truncf %20 : vector<8x256xf32> to vector<8x256xbf16>
    %c2 = arith.constant 2 : index
    %c0_15 = arith.constant 0 : index
    %c0_16 = arith.constant 0 : index
    %22 = vector.load %arg2[%c2, %c0_15, %c0_16] : memref<4x256x256xbf16, #tpu.memory_space<vmem>>, vector<1x256x256xbf16>
    %23 = vector.shape_cast %22 : vector<1x256x256xbf16> to vector<256x256xbf16>
    %cst_17 = arith.constant dense<0.000000e+00> : vector<8x256xf32>
    %24 = tpu.matmul %21, %23, %cst_17 {dimension_numbers = #tpu.dot_dimension_numbers<[1], [0], [0], [1], [0, 0, 1, 1], [], []>} : vector<8x256xbf16>, vector<256x256xbf16>, vector<8x256xf32> -> vector<8x256xf32>
    %c2_18 = arith.constant 2 : index
    %c0_19 = arith.constant 0 : index
    %c0_20 = arith.constant 0 : index
    %25 = vector.load %arg3[%c2_18, %c0_19, %c0_20] : memref<4x1x256xf32, #tpu.memory_space<vmem>>, vector<1x1x256xf32>
    %26 = vector.shape_cast %25 : vector<1x1x256xf32> to vector<1x256xf32>
    %27 = vector.broadcast %26 : vector<1x256xf32> to vector<8x256xf32>
    %28 = arith.addf %24, %27 : vector<8x256xf32>
    %cst_21 = arith.constant 0.000000e+00 : f32
    %29 = vector.broadcast %cst_21 : f32 to vector<8x256xf32>
    %30 = arith.maximumf %28, %29 : vector<8x256xf32>
    %31 = arith.truncf %30 : vector<8x256xf32> to vector<8x256xbf16>
    %c3 = arith.constant 3 : index
    %c0_22 = arith.constant 0 : index
    %c0_23 = arith.constant 0 : index
    %32 = vector.load %arg2[%c3, %c0_22, %c0_23] : memref<4x256x256xbf16, #tpu.memory_space<vmem>>, vector<1x256x256xbf16>
    %33 = vector.shape_cast %32 : vector<1x256x256xbf16> to vector<256x256xbf16>
    %cst_24 = arith.constant dense<0.000000e+00> : vector<8x256xf32>
    %34 = tpu.matmul %31, %33, %cst_24 {dimension_numbers = #tpu.dot_dimension_numbers<[1], [0], [0], [1], [0, 0, 1, 1], [], []>} : vector<8x256xbf16>, vector<256x256xbf16>, vector<8x256xf32> -> vector<8x256xf32>
    %c3_25 = arith.constant 3 : index
    %c0_26 = arith.constant 0 : index
    %c0_27 = arith.constant 0 : index
    %35 = vector.load %arg3[%c3_25, %c0_26, %c0_27] : memref<4x1x256xf32, #tpu.memory_space<vmem>>, vector<1x1x256xf32>
    %36 = vector.shape_cast %35 : vector<1x1x256xf32> to vector<1x256xf32>
    %37 = vector.broadcast %36 : vector<1x256xf32> to vector<8x256xf32>
    %38 = arith.addf %34, %37 : vector<8x256xf32>
    %cst_28 = arith.constant 0.000000e+00 : f32
    %39 = vector.broadcast %cst_28 : f32 to vector<8x256xf32>
    %40 = arith.maximumf %38, %39 : vector<8x256xf32>
    %41 = arith.truncf %40 : vector<8x256xf32> to vector<8x256xbf16>
    %c0_29 = arith.constant 0 : index
    %c0_30 = arith.constant 0 : index
    %42 = vector.load %arg4[%c0_29, %c0_30] : memref<256x8xbf16, #tpu.memory_space<vmem>>, vector<256x8xbf16>
    %cst_31 = arith.constant dense<0.000000e+00> : vector<8x8xf32>
    %43 = tpu.matmul %41, %42, %cst_31 {dimension_numbers = #tpu.dot_dimension_numbers<[1], [0], [0], [1], [0, 0, 1, 1], [], []>} : vector<8x256xbf16>, vector<256x8xbf16>, vector<8x8xf32> -> vector<8x8xf32>
    %c0_32 = arith.constant 0 : index
    %c0_33 = arith.constant 0 : index
    %44 = vector.load %arg5[%c0_32, %c0_33] : memref<1x8xf32, #tpu.memory_space<vmem>>, vector<1x8xf32>
    %45 = vector.broadcast %44 : vector<1x8xf32> to vector<8x8xf32>
    %46 = arith.addf %43, %45 : vector<8x8xf32>
    %c0_34 = arith.constant 0 : index
    %c0_35 = arith.constant 0 : index
    %47 = vector.load %arg6[%c0_34, %c0_35] : memref<8x8xf32, #tpu.memory_space<vmem>>, vector<8x8xf32>
    tpu.vector_store %arg6[%c0_34, %c0_35], %46 {strides = array<i32>} : memref<8x8xf32, #tpu.memory_space<vmem>>, vector<8x8xf32>,
    return
  }
  func.func @transform_0(%arg0: i32) -> (i32, i32) {
    %c0_i32 = arith.constant 0 : i32
    %c0_i32_0 = arith.constant 0 : i32
    return %arg0, %c0_i32 : i32, i32
  }
  func.func @transform_1(%arg0: i32) -> (i32, i32, i32) {
    %c0_i32 = arith.constant 0 : i32
    %c0_i32_0 = arith.constant 0 : i32
    %c0_i32_1 = arith.constant 0 : i32
    %c0_i32_2 = arith.constant 0 : i32
    return %c0_i32, %c0_i32_0, %c0_i32_1 : i32, i32, i32
  }
  func.func @transform_2(%arg0: i32) -> (i32, i32, i32) {
    %c0_i32 = arith.constant 0 : i32
    %c0_i32_0 = arith.constant 0 : i32
    %c0_i32_1 = arith.constant 0 : i32
    %c0_i32_2 = arith.constant 0 : i32
    return %c0_i32, %c0_i32_0, %c0_i32_1 : i32, i32, i32
  }
  func.func @transform_3(%arg0: i32) -> (i32, i32) {
    %c0_i32 = arith.constant 0 : i32
    %c0_i32_0 = arith.constant 0 : i32
    %c0_i32_1 = arith.constant 0 : i32
    return %c0_i32, %c0_i32_0 : i32, i32
  }
  func.func @transform_4(%arg0: i32) -> (i32, i32) {
    %c0_i32 = arith.constant 0 : i32
    %c0_i32_0 = arith.constant 0 : i32
    %c0_i32_1 = arith.constant 0 : i32
    return %c0_i32, %c0_i32_0 : i32, i32
  }
  func.func @transform_5(%arg0: i32) -> (i32, i32) {
    %c0_i32 = arith.constant 0 : i32
    %c0_i32_0 = arith.constant 0 : i32
    return %arg0, %c0_i32 : i32, i32
  }
}

</mosaic_0001>

<bundles_post_ra>
// kernel: tpu_custom_call.1
= control target key start
LH: loop header
LB: loop body
LE: loop exit
PB: predicated region body
PF: predicated region fallthrough
CT: control target
= control target key end

     0   :  { %10 = vsyncpa [#allocation3], 0  ;;  %s1803_s0 = inlined_call_operand.vmem [shape: f32[8,256], index: 0, kind: input, shape index: {}]   ;;  %s1804_s1 = inlined_call_operand.hbm [shape: bf16[4,256,256], index: 1, kind: input, shape index: {}]   ;;  %s1805_s2 = inlined_call_operand.vmem [shape: f32[4,1,256], index: 2, kind: input, shape index: {}]   ;;  %s1806_s3 = inlined_call_operand.vmem [shape: bf16[256,8], index: 3, kind: input, shape index: {}]   ;;  %s1807_s4 = inlined_call_operand.vmem [shape: f32[1,8], index: 4, kind: input, shape index: {}]   ;;  %s1808_s5 = inlined_call_operand.hbm [shape: f32[8,8], index: 5, kind: output, shape index: {}]  }
   0x1   :  { %11 = vsyncpa [#allocation4], 0  ;;  %s1664_s18 = smov [#allocation2]   ;;  %s1616_s22 = scalar_lea.hbm %s1804_s1, 16384 }
   0x2   :  { %s19_s19 = sshll.u32 %s1664_s18, 4  ;;  %p1617_p0 = scmp.ne.s32.totalorder %s1804_s1, %s1616_s22  ;;  %s20_s19 = int_to_ptr.vmem [resolvable:$true] %s19_s19 }
   0x3   :  { %p1620_p1 = scmp.lt.u32.totalorder %s1616_s22, %s1804_s1 }
   0x5   :  { %p1622_p2 = pnand %p1620_p1, %p1617_p0 }
   0x7   :  { %1625 = shalt.err (!%p1622_p2)
}
   0x8   :  { %s1626_s27 = scalar_lea.vmem %s20_s19, 16384  ;;  %p1631_p4 = scmp.lt.s32.totalorder %s20_s19, %s20_s19 }
   0x9   :  { %p1627_p3 = scmp.ne.s32.totalorder %s20_s19, %s1626_s27  ;;  %p1632_p5 = scmp.lt.s32.totalorder %s1626_s27, %s1626_s27 }
   0xb   :  { %p1633_p6 = por %p1632_p5, %p1631_p4 }
   0xd   :  { %p1634_p7 = pnand %p1633_p6, %p1627_p3 }
   0xf   :  { %1637 = shalt.err (!%p1634_p7)
}
  0x10   :  { %s1665_s28 = smov 128   ;;  %s1666_s29 = smov 8  }
  0x11   :  { %25 = dma.hbm_to_vmem [thread:$0]  %s1804_s1, 16384, %s20_s19, [#allocation3], %s1665_s28, %s1665_s28, %s1666_s29  }
  0x12   :  { %1660 = dma.done.wait [#allocation3], 16384  }
  0x13   :  { %1661 = vsyncadd [#allocation3], 4294950912  ;;  %v1408_v0 = vld [vmem:[#allocation2 + $0x4] ss:$8 sps:$4 sm:$0xff]   ;;  %v1410_v1 = vld [vmem:[#allocation2] ss:$8 sps:$4 sm:$0xff]  }
  0x14   :  { %244 = vmatprep.subr.bf16.mxu0 %v1408_v0  ;;  %v1411_v2 = vld [vmem:[#allocation2 + $0x14] ss:$8 sps:$4 sm:$0xff]   ;;  %v1413_v3 = vld [vmem:[#allocation2 + $0x10] ss:$8 sps:$4 sm:$0xff]   ;;  %v1414_v4 = vld [vmem:[#allocation2 + $0x24] ss:$8 sps:$4 sm:$0xff]  }
  0x15   :  { %245 = vmatpush1.bf16.msra.mxu0 %v1410_v1  ;;  %v1416_v5 = vld [vmem:[#allocation2 + $0x20] ss:$8 sps:$4 sm:$0xff]   ;;  %v1417_v6 = vld [vmem:[#allocation2 + $0x34] ss:$8 sps:$4 sm:$0xff]   ;;  %v1419_v7 = vld [vmem:[#allocation2 + $0x30] ss:$8 sps:$4 sm:$0xff]  }
  0x16   :  { %246 = vmatprep.subr.bf16.mxu0 %v1411_v2  ;;  %v1420_v8 = vld [vmem:[#allocation2 + $0x44] ss:$8 sps:$4 sm:$0xff]   ;;  %v1422_v9 = vld [vmem:[#allocation2 + $0x40] ss:$8 sps:$4 sm:$0xff]   ;;  %v1423_v10 = vld [vmem:[#allocation2 + $0x54] ss:$8 sps:$4 sm:$0xff]  }
  0x17   :  { %v1425_v11 = vld [vmem:[#allocation2 + $0x50] ss:$8 sps:$4 sm:$0xff]   ;;  %v1426_v12 = vld [vmem:[#allocation2 + $0x64] ss:$8 sps:$4 sm:$0xff]   ;;  %v1428_v13 = vld [vmem:[#allocation2 + $0x60] ss:$8 sps:$4 sm:$0xff]  }
  0x18   :  { %v37_v14 = vld [vmem:[%s1803_s0 + $0x8] sm:$0xff]  ;;  %v1429_v18 = vld [vmem:[#allocation2 + $0x74] ss:$8 sps:$4 sm:$0xff]   ;;  %v1431_v20 = vld [vmem:[#allocation2 + $0x70] ss:$8 sps:$4 sm:$0xff]   ;;  %vm1217_vm0 = vcmask 64512  }
  0x19   :  { %247 = vmatpush1.bf16.msra.mxu0 %v1413_v3  ;;  %v39_v15 = vpack.c.bf16 %v37_v14, %v37_v14  ;;  %v1456_v16 = vld [vmem:[#allocation2 + $0x104] ss:$8 sps:$4 sm:$0xff]   ;;  %v1458_v17 = vld [vmem:[#allocation2 + $0x100] ss:$8 sps:$4 sm:$0xff]   ;;  %v1459_v19 = vld [vmem:[#allocation2 + $0x114] ss:$8 sps:$4 sm:$0xff]  }
  0x1a   :  { %248 = vmatprep.subr.bf16.mxu0 %v1414_v4  ;;  %495 = vmatprep.subr.bf16.mxu1 %v1456_v16  ;;  %v1461_v21 = vld [vmem:[#allocation2 + $0x110] ss:$8 sps:$4 sm:$0xff]   ;;  %v1462_v22 = vld [vmem:[#allocation2 + $0x124] ss:$8 sps:$4 sm:$0xff]   ;;  %v1434_v24 = vld [vmem:[#allocation2 + $0x80] ss:$8 sps:$4 sm:$0xff]  }
  0x1b   :  { %276 = vmatprep.mubr.bf16.mxu0 %v39_v15  ;;  %496 = vmatpush1.bf16.msra.mxu1 %v1458_v17  ;;  %v1432_v23 = vld [vmem:[#allocation2 + $0x84] ss:$8 sps:$4 sm:$0xff]   ;;  %v1464_v25 = vld [vmem:[#allocation2 + $0x120] ss:$8 sps:$4 sm:$0xff]   ;;  %v1465_v26 = vld [vmem:[#allocation2 + $0x134] ss:$8 sps:$4 sm:$0xff]  }
  0x1c   :  { %497 = vmatprep.subr.bf16.mxu1 %v1459_v19  ;;  %v1435_v27 = vld [vmem:[#allocation2 + $0x94] ss:$8 sps:$4 sm:$0xff]   ;;  %v1437_v28 = vld [vmem:[#allocation2 + $0x90] ss:$8 sps:$4 sm:$0xff]   ;;  %v1468_v30 = vld [vmem:[#allocation2 + $0x144] ss:$8 sps:$4 sm:$0xff]  }
  0x1d   :  { %249 = vmatpush1.bf16.msra.mxu0 %v1416_v5  ;;  %v1467_v29 = vld [vmem:[#allocation2 + $0x130] ss:$8 sps:$4 sm:$0xff]   ;;  %v1438_v31 = vld [vmem:[#allocation2 + $0xa4] ss:$8 sps:$4 sm:$0xff]   ;;  %v1440_v32 = vld [vmem:[#allocation2 + $0xa0] ss:$8 sps:$4 sm:$0xff]  }
  0x1e   :  { %250 = vmatprep.subr.bf16.mxu0 %v1417_v6  ;;  %v1470_v33 = vld [vmem:[#allocation2 + $0x140] ss:$8 sps:$4 sm:$0xff]   ;;  %v1471_v34 = vld [vmem:[#allocation2 + $0x154] ss:$8 sps:$4 sm:$0xff]   ;;  %v1473_v36 = vld [vmem:[#allocation2 + $0x150] ss:$8 sps:$4 sm:$0xff]  }
  0x1f   :  { %498 = vmatpush1.bf16.msra.mxu1 %v1461_v21  ;;  %v1441_v35 = vld [vmem:[#allocation2 + $0xb4] ss:$8 sps:$4 sm:$0xff]   ;;  %v1443_v37 = vld [vmem:[#allocation2 + $0xb0] ss:$8 sps:$4 sm:$0xff]   ;;  %v1474_v38 = vld [vmem:[#allocation2 + $0x164] ss:$8 sps:$4 sm:$0xff]  }
  0x20   :  { %499 = vmatprep.subr.bf16.mxu1 %v1462_v22  ;;  %v1444_v39 = vld [vmem:[#allocation2 + $0xc4] ss:$8 sps:$4 sm:$0xff]   ;;  %v1476_v40 = vld [vmem:[#allocation2 + $0x160] ss:$8 sps:$4 sm:$0xff]   ;;  %v1477_v42 = vld [vmem:[#allocation2 + $0x174] ss:$8 sps:$4 sm:$0xff]  }
  0x21   :  { %251 = vmatpush1.bf16.msra.mxu0 %v1419_v7  ;;  %v1446_v41 = vld [vmem:[#allocation2 + $0xc0] ss:$8 sps:$4 sm:$0xff]   ;;  %v1447_v43 = vld [vmem:[#allocation2 + $0xd4] ss:$8 sps:$4 sm:$0xff]   ;;  %v1479_v44 = vld [vmem:[#allocation2 + $0x170] ss:$8 sps:$4 sm:$0xff]  }
  0x22   :  { %252 = vmatprep.subr.bf16.mxu0 %v1420_v8  ;;  %v1449_v45 = vld [vmem:[#allocation2 + $0xd0] ss:$8 sps:$4 sm:$0xff]   ;;  %v1480_v46 = vld [vmem:[#allocation2 + $0x184] ss:$8 sps:$4 sm:$0xff]   ;;  %v1482_v48 = vld [vmem:[#allocation2 + $0x180] ss:$8 sps:$4 sm:$0xff]  }
  0x23   :  { %500 = vmatpush1.bf16.msra.mxu1 %v1464_v25  ;;  %v1450_v47 = vld [vmem:[#allocation2 + $0xe4] ss:$8 sps:$4 sm:$0xff]   ;;  %v1452_v49 = vld [vmem:[#allocation2 + $0xe0] ss:$8 sps:$4 sm:$0xff]   ;;  %v1483_v50 = vld [vmem:[#allocation2 + $0x194] ss:$8 sps:$4 sm:$0xff]  }
  0x24   :  { %501 = vmatprep.subr.bf16.mxu1 %v1465_v26  ;;  %v1453_v51 = vld [vmem:[#allocation2 + $0xf4] ss:$8 sps:$4 sm:$0xff]   ;;  %v1485_v52 = vld [vmem:[#allocation2 + $0x190] ss:$8 sps:$4 sm:$0xff]   ;;  %v36_v54 = vld [vmem:[%s1803_s0] sm:$0xff] }
  0x25   :  { %253 = vmatpush1.bf16.msra.mxu0 %v1422_v9  ;;  %v1455_v53 = vld [vmem:[#allocation2 + $0xf0] ss:$8 sps:$4 sm:$0xff]   ;;  %v1486_v55 = vld [vmem:[#allocation2 + $0x1a4] ss:$8 sps:$4 sm:$0xff]   ;;  %v1488_v56 = vld [vmem:[#allocation2 + $0x1a0] ss:$8 sps:$4 sm:$0xff]   ;;  %v38_v58 = vpack.c.bf16 %v36_v54, %v36_v54 }
  0x26   :  { %254 = vmatprep.subr.bf16.mxu0 %v1423_v10  ;;  %v1489_v57 = vld [vmem:[#allocation2 + $0x1b4] ss:$8 sps:$4 sm:$0xff]   ;;  %v1491_v59 = vld [vmem:[#allocation2 + $0x1b0] ss:$8 sps:$4 sm:$0xff]   ;;  %v1492_v60 = vld [vmem:[#allocation2 + $0x1c4] ss:$8 sps:$4 sm:$0xff]  }
  0x27   :  { %502 = vmatpush1.bf16.msra.mxu1 %v1467_v29  ;;  %v1494_v61 = vld [vmem:[#allocation2 + $0x1c0] ss:$8 sps:$4 sm:$0xff]   ;;  %v1495_v62 = vld [vmem:[#allocation2 + $0x1d4] ss:$8 sps:$4 sm:$0xff]   ;;  %v1497_v63 = vld [vmem:[#allocation2 + $0x1d0] ss:$8 sps:$4 sm:$0xff]  }
  0x28   :  { %503 = vmatprep.subr.bf16.mxu1 %v1468_v30  ;;  %v1498_v0 = vld [vmem:[#allocation2 + $0x1e4] ss:$8 sps:$4 sm:$0xff]   ;;  %v1500_v1 = vld [vmem:[#allocation2 + $0x1e0] ss:$8 sps:$4 sm:$0xff]   ;;  %v1501_v2 = vld [vmem:[#allocation2 + $0x1f4] ss:$8 sps:$4 sm:$0xff]  }
  0x29   :  { %255 = vmatpush1.bf16.msra.mxu0 %v1425_v11  ;;  %v1503_v3 = vld [vmem:[#allocation2 + $0x1f0] ss:$8 sps:$4 sm:$0xff]   ;;  %v1504_v4 = vld [vmem:[#allocation2 + $0x200] ss:$8 sps:$4 sm:$0xff]   ;;  %v1506_v5 = vld [vmem:[#allocation2 + $0x204] ss:$8 sps:$4 sm:$0xff]  }
  0x2a   :  { %256 = vmatprep.subr.bf16.mxu0 %v1426_v12  ;;  %v1509_v6 = vld [vmem:[#allocation2 + $0x214] ss:$8 sps:$4 sm:$0xff]   ;;  %v1507_v7 = vld [vmem:[#allocation2 + $0x210] ss:$8 sps:$4 sm:$0xff]   ;;  %v1512_v8 = vld [vmem:[#allocation2 + $0x224] ss:$8 sps:$4 sm:$0xff]  }
  0x2b   :  { %504 = vmatpush1.bf16.msra.mxu1 %v1470_v33  ;;  %v1510_v9 = vld [vmem:[#allocation2 + $0x220] ss:$8 sps:$4 sm:$0xff]   ;;  %v1515_v10 = vld [vmem:[#allocation2 + $0x234] ss:$8 sps:$4 sm:$0xff]   ;;  %v1513_v11 = vld [vmem:[#allocation2 + $0x230] ss:$8 sps:$4 sm:$0xff]  }
  0x2c   :  { %505 = vmatprep.subr.bf16.mxu1 %v1471_v34  ;;  %v1518_v12 = vld [vmem:[#allocation2 + $0x244] ss:$8 sps:$4 sm:$0xff]   ;;  %v1521_v14 = vld [vmem:[#allocation2 + $0x254] ss:$8 sps:$4 sm:$0xff]   ;;  %v1519_v15 = vld [vmem:[#allocation2 + $0x250] ss:$8 sps:$4 sm:$0xff]  }
  0x2d   :  { %257 = vmatpush1.bf16.msra.mxu0 %v1428_v13  ;;  %v1516_v13 = vld [vmem:[#allocation2 + $0x240] ss:$8 sps:$4 sm:$0xff]   ;;  %v1524_v16 = vld [vmem:[#allocation2 + $0x264] ss:$8 sps:$4 sm:$0xff]   ;;  %v1525_v19 = vld [vmem:[#allocation2 + $0x270] ss:$8 sps:$4 sm:$0xff]  }
  0x2e   :  { %258 = vmatprep.subr.bf16.mxu0 %v1429_v18  ;;  %v1522_v17 = vld [vmem:[#allocation2 + $0x260] ss:$8 sps:$4 sm:$0xff]   ;;  %v1527_v18 = vld [vmem:[#allocation2 + $0x274] ss:$8 sps:$4 sm:$0xff]   ;;  %v1554_v54 = vld [vmem:[#allocation2 + $0x304] ss:$8 sps:$4 sm:$0xff]  }
  0x2f   :  { %506 = vmatpush1.bf16.msra.mxu1 %v1473_v36  ;;  %v1528_v21 = vld [vmem:[#allocation2 + $0x280] ss:$8 sps:$4 sm:$0xff]   ;;  %v1533_v22 = vld [vmem:[#allocation2 + $0x294] ss:$8 sps:$4 sm:$0xff]  }
  0x30   :  { %507 = vmatprep.subr.bf16.mxu1 %v1474_v38  ;;  %v1534_v25 = vld [vmem:[#allocation2 + $0x2a0] ss:$8 sps:$4 sm:$0xff]   ;;  %v1539_v26 = vld [vmem:[#allocation2 + $0x2b4] ss:$8 sps:$4 sm:$0xff]  }
  0x31   :  { %259 = vmatpush1.bf16.msra.mxu0 %v1431_v20  ;;  %v1530_v20 = vld [vmem:[#allocation2 + $0x284] ss:$8 sps:$4 sm:$0xff]   ;;  %v1540_v29 = vld [vmem:[#allocation2 + $0x2c0] ss:$8 sps:$4 sm:$0xff]   ;;  %v1545_v30 = vld [vmem:[#allocation2 + $0x2d4] ss:$8 sps:$4 sm:$0xff]  }
  0x32   :  { %260 = vmatprep.subr.bf16.mxu0 %v1432_v23  ;;  %v1531_v23 = vld [vmem:[#allocation2 + $0x290] ss:$8 sps:$4 sm:$0xff]  }
  0x33   :  { %508 = vmatpush1.bf16.msra.mxu1 %v1476_v40 }
  0x34   :  { %509 = vmatprep.subr.bf16.mxu1 %v1477_v42 }
  0x35   :  { %261 = vmatpush1.bf16.msra.mxu0 %v1434_v24  ;;  %v1536_v24 = vld [vmem:[#allocation2 + $0x2a4] ss:$8 sps:$4 sm:$0xff]  }
  0x36   :  { %262 = vmatprep.subr.bf16.mxu0 %v1435_v27  ;;  %v1537_v27 = vld [vmem:[#allocation2 + $0x2b0] ss:$8 sps:$4 sm:$0xff]  }
  0x37   :  { %510 = vmatpush1.bf16.msra.mxu1 %v1479_v44 }
  0x38   :  { %511 = vmatprep.subr.bf16.mxu1 %v1480_v46 }
  0x39   :  { %263 = vmatpush1.bf16.msra.mxu0 %v1437_v28  ;;  %v1542_v28 = vld [vmem:[#allocation2 + $0x2c4] ss:$8 sps:$4 sm:$0xff]  }
  0x3a   :  { %264 = vmatprep.subr.bf16.mxu0 %v1438_v31  ;;  %v1543_v31 = vld [vmem:[#allocation2 + $0x2d0] ss:$8 sps:$4 sm:$0xff]  }
  0x3b   :  { %512 = vmatpush1.bf16.msra.mxu1 %v1482_v48 }
  0x3c   :  { %513 = vmatprep.subr.bf16.mxu1 %v1483_v50  ;;  %v1546_v50 = vld [vmem:[#allocation2 + $0x2e0] ss:$8 sps:$4 sm:$0xff]  }
  0x3d   :  { %265 = vmatpush1.bf16.msra.mxu0 %v1440_v32  ;;  %v74_v32 = vlaneseq }
  0x3e   :  { %266 = vmatprep.subr.bf16.mxu0 %v1441_v35  ;;  %v72_v35 = vld [vmem:[%s1805_s2] sm:$0x3] }
  0x3f   :  { %514 = vmatpush1.bf16.msra.mxu1 %v1485_v52  ;;  %v75_v33 = vshrl.u32 %v74_v32, 7  ;;  %v1549_v52 = vld [vmem:[#allocation2 + $0x2f0] ss:$8 sps:$4 sm:$0xff]   ;;  %v1599_v32 = vld [vmem:[#allocation2 + $0x3f4] ss:$8 sps:$4 sm:$0xff]  }
  0x40   :  { %515 = vmatprep.subr.bf16.mxu1 %v1486_v55  ;;  %v1557_v55 = vld [vmem:[#allocation2 + $0x314] ss:$8 sps:$4 sm:$0xff]  }
  0x41   :  { %267 = vmatpush1.bf16.msra.mxu0 %v1443_v37  ;;  %v1716_v34 = vsub.s32 0, %v75_v33  ;;  %v1721_v36 = vsub.s32 1, %v75_v33  ;;  %v1597_v33 = vld [vmem:[#allocation2 + $0x3f0] ss:$8 sps:$4 sm:$0xff]  }
  0x42   :  { %268 = vmatprep.subr.bf16.mxu0 %v1444_v39 }
  0x43   :  { %516 = vmatpush1.bf16.msra.mxu1 %v1488_v56  ;;  %v77_v37 = vrot.slane %v72_v35, %v1716_v34  ;;  %v81_v38 = vrot.slane %v72_v35, %v1721_v36  ;;  %v1555_v56 = vld [vmem:[#allocation2 + $0x310] ss:$8 sps:$4 sm:$0xff]   ;;  %v1600_v35 = vld [vmem:[%s1806_s3 + $0x40] sm:$0xff]  }
  0x44   :  { %517 = vmatprep.subr.bf16.mxu1 %v1489_v57  ;;  %v1560_v57 = vld [vmem:[#allocation2 + $0x324] ss:$8 sps:$4 sm:$0xff]  }
  0x45   :  { %269 = vmatpush1.bf16.msra.mxu0 %v1446_v41 }
  0x46   :  { %270 = vmatprep.subr.bf16.mxu0 %v1447_v43 }
  0x47   :  { %518 = vmatpush1.bf16.msra.mxu1 %v1491_v59  ;;  %v1563_v59 = vld [vmem:[#allocation2 + $0x334] ss:$8 sps:$4 sm:$0xff]  }
  0x48   :  { %519 = vmatprep.subr.bf16.mxu1 %v1492_v60  ;;  %v1561_v60 = vld [vmem:[#allocation2 + $0x330] ss:$8 sps:$4 sm:$0xff]  }
  0x49   :  { %271 = vmatpush1.bf16.msra.mxu0 %v1449_v45 }
  0x4a   :  { %272 = vmatprep.subr.bf16.mxu0 %v1450_v47 }
  0x4b   :  { %520 = vmatpush1.bf16.msra.mxu1 %v1494_v61  ;;  %v1566_v61 = vld [vmem:[#allocation2 + $0x344] ss:$8 sps:$4 sm:$0xff]  }
  0x4c   :  { %521 = vmatprep.subr.bf16.mxu1 %v1495_v62  ;;  %v1564_v62 = vld [vmem:[#allocation2 + $0x340] ss:$8 sps:$4 sm:$0xff]  }
  0x4d   :  { %273 = vmatpush1.bf16.msra.mxu0 %v1452_v49  ;;  %v1548_v49 = vld [vmem:[#allocation2 + $0x2e4] ss:$8 sps:$4 sm:$0xff]  }
  0x4e   :  { %274 = vmatprep.subr.bf16.mxu0 %v1453_v51  ;;  %v1551_v51 = vld [vmem:[#allocation2 + $0x2f4] ss:$8 sps:$4 sm:$0xff]  }
  0x4f   :  { %522 = vmatpush1.bf16.msra.mxu1 %v1497_v63  ;;  %v1569_v63 = vld [vmem:[#allocation2 + $0x354] ss:$8 sps:$4 sm:$0xff]  }
  0x50   :  { %523 = vmatprep.subr.bf16.mxu1 %v1498_v0  ;;  %v1567_v0 = vld [vmem:[#allocation2 + $0x350] ss:$8 sps:$4 sm:$0xff]  }
  0x51   :  { %275 = vmatpush1.bf16.msra.mxu0 %v1455_v53  ;;  %v1552_v53 = vld [vmem:[#allocation2 + $0x300] ss:$8 sps:$4 sm:$0xff]  }
  0x52   :  { %746 = vmatprep.subr.bf16.mxu0 %v1506_v5  ;;  %v1578_v5 = vld [vmem:[#allocation2 + $0x384] ss:$8 sps:$4 sm:$0xff]  }
  0x53   :  { %524 = vmatpush1.bf16.msra.mxu1 %v1500_v1  ;;  %v1572_v1 = vld [vmem:[#allocation2 + $0x364] ss:$8 sps:$4 sm:$0xff]  }
  0x54   :  { %277 = vmatmul.mubr.bf16.vlgmr.msra.gmra.mrb[0].mxu0 %v38_v58  ;;  %525 = vmatprep.subr.bf16.mxu1 %v1501_v2  ;;  %v1558_v58 = vld [vmem:[#allocation2 + $0x320] ss:$8 sps:$4 sm:$0xff]  }
  0x55   :  { %747 = vmatpush1.bf16.msra.mxu0 %v1504_v4  ;;  %v1570_v2 = vld [vmem:[#allocation2 + $0x360] ss:$8 sps:$4 sm:$0xff]   ;;  %v1573_v4 = vld [vmem:[#allocation2 + $0x370] ss:$8 sps:$4 sm:$0xff]  }
  0x56   :  { %748 = vmatprep.subr.bf16.mxu0 %v1509_v6  ;;  %v1576_v6 = vld [vmem:[#allocation2 + $0x380] ss:$8 sps:$4 sm:$0xff]  }
  0x57   :  { %526 = vmatpush1.bf16.msra.mxu1 %v1503_v3  ;;  %v1575_v3 = vld [vmem:[#allocation2 + $0x374] ss:$8 sps:$4 sm:$0xff]  }
  0x58   :  { %997 = vmatprep.subr.bf16.mxu1 %v1554_v54 }
  0x59   :  { %749 = vmatpush1.bf16.msra.mxu0 %v1507_v7  ;;  %v1581_v7 = vld [vmem:[#allocation2 + $0x394] ss:$8 sps:$4 sm:$0xff]  }
  0x5a   :  { %750 = vmatprep.subr.bf16.mxu0 %v1512_v8  ;;  %v1579_v8 = vld [vmem:[#allocation2 + $0x390] ss:$8 sps:$4 sm:$0xff]  }
  0x5d   :  { %751 = vmatpush1.bf16.msra.mxu0 %v1510_v9  ;;  %v1584_v9 = vld [vmem:[#allocation2 + $0x3a4] ss:$8 sps:$4 sm:$0xff]  }
  0x5e   :  { %752 = vmatprep.subr.bf16.mxu0 %v1515_v10  ;;  %v1582_v10 = vld [vmem:[#allocation2 + $0x3a0] ss:$8 sps:$4 sm:$0xff]  }
  0x61   :  { %753 = vmatpush1.bf16.msra.mxu0 %v1513_v11  ;;  %v1587_v11 = vld [vmem:[#allocation2 + $0x3b4] ss:$8 sps:$4 sm:$0xff]  }
  0x62   :  { %754 = vmatprep.subr.bf16.mxu0 %v1518_v12  ;;  %v1585_v12 = vld [vmem:[#allocation2 + $0x3b0] ss:$8 sps:$4 sm:$0xff]  }
  0x65   :  { %755 = vmatpush1.bf16.msra.mxu0 %v1516_v13  ;;  %v1590_v13 = vld [vmem:[#allocation2 + $0x3c4] ss:$8 sps:$4 sm:$0xff]  }
  0x66   :  { %756 = vmatprep.subr.bf16.mxu0 %v1521_v14  ;;  %v1588_v14 = vld [vmem:[#allocation2 + $0x3c0] ss:$8 sps:$4 sm:$0xff]  }
  0x69   :  { %757 = vmatpush1.bf16.msra.mxu0 %v1519_v15  ;;  %v1593_v15 = vld [vmem:[#allocation2 + $0x3d4] ss:$8 sps:$4 sm:$0xff]  }
  0x6a   :  { %758 = vmatprep.subr.bf16.mxu0 %v1524_v16  ;;  %v1591_v16 = vld [vmem:[#allocation2 + $0x3d0] ss:$8 sps:$4 sm:$0xff]  }
  0x6d   :  { %759 = vmatpush1.bf16.msra.mxu0 %v1522_v17  ;;  %v1266_v17 = vld [vmem:[%s1805_s2 + $0x2] sm:$0x3] }
  0x6e   :  { %760 = vmatprep.subr.bf16.mxu0 %v1527_v18  ;;  %v328_v18 = vrot.slane %v1266_v17, %v1716_v34 }
  0x71   :  { %761 = vmatpush1.bf16.msra.mxu0 %v1525_v19  ;;  %v332_v19 = vrot.slane %v1266_v17, %v1721_v36 }
  0x72   :  { %762 = vmatprep.subr.bf16.mxu0 %v1530_v20 }
  0x75   :  { %763 = vmatpush1.bf16.msra.mxu0 %v1528_v21 }
  0x76   :  { %764 = vmatprep.subr.bf16.mxu0 %v1533_v22 }
  0x79   :  { %765 = vmatpush1.bf16.msra.mxu0 %v1531_v23 }
  0x7a   :  { %766 = vmatprep.subr.bf16.mxu0 %v1536_v24 }
  0x7d   :  { %767 = vmatpush1.bf16.msra.mxu0 %v1534_v25 }
  0x7e   :  { %768 = vmatprep.subr.bf16.mxu0 %v1539_v26 }
  0x81   :  { %769 = vmatpush1.bf16.msra.mxu0 %v1537_v27 }
  0x82   :  { %770 = vmatprep.subr.bf16.mxu0 %v1542_v28 }
  0x85   :  { %771 = vmatpush1.bf16.msra.mxu0 %v1540_v29 }
  0x86   :  { %772 = vmatprep.subr.bf16.mxu0 %v1545_v30  ;;  %v1596_v30 = vld [vmem:[#allocation2 + $0x3e4] ss:$8 sps:$4 sm:$0xff]  }
  0x89   :  { %773 = vmatpush1.bf16.msra.mxu0 %v1543_v31  ;;  %v1594_v31 = vld [vmem:[#allocation2 + $0x3e0] ss:$8 sps:$4 sm:$0xff]  }
  0x8a   :  { %774 = vmatprep.subr.bf16.mxu0 %v1548_v49 }
  0x8d   :  { %775 = vmatpush1.bf16.msra.mxu0 %v1546_v50 }
  0x8e   :  { %776 = vmatprep.subr.bf16.mxu0 %v1551_v51 }
  0x91   :  { %777 = vmatpush1.bf16.msra.mxu0 %v1549_v52 }
  0x92   :  { %1382 = vmatprep.subr.bf16.mxu0 %v1600_v35 }
 0x127   :  { %v278_v39 = vpop.f32.mrb[0].mxu0 }
 0x128   :  { %v279_v40 = vadd.f32 %v278_v39, %v77_v37  ;;  %v280_v41 = vpop.f32.mrb[1].mxu0  ;;  %v1601_v37 = vld [vmem:[%s1806_s3] sm:$0xff]   ;;  %v1603_v39 = vld [vmem:[%s1806_s3 + $0x8] sm:$0xff]  }
 0x129   :  { %v281_v42 = vadd.f32 %v280_v41, %v81_v38  ;;  %v282_v43 = vpop.f32.mrb[2].mxu0  ;;  %v1602_v38 = vld [vmem:[%s1806_s3 + $0x48] sm:$0xff]   ;;  %v1605_v41 = vld [vmem:[%s1806_s3 + $0x10] sm:$0xff]  }
 0x12a   :  { %v285_v44 = vmax.f32 %v279_v40, 0.0  ;;  %v283_v45 = vpop.f32.mrb[3].mxu0  ;;  %v1604_v40 = vld [vmem:[%s1806_s3 + $0x50] sm:$0xff]   ;;  %v1607_v43 = vld [vmem:[%s1806_s3 + $0x18] sm:$0xff]  }
 0x12b   :  { %v286_v46 = vmax.f32 %v281_v42, 0.0  ;;  %v1606_v42 = vld [vmem:[%s1806_s3 + $0x58] sm:$0xff]   ;;  %v1609_v45 = vld [vmem:[%s1806_s3 + $0x20] sm:$0xff]  }
 0x12c   :  { %v287_v48 = vpack.c.bf16 %v285_v44, %v285_v44  ;;  %v1608_v44 = vld [vmem:[%s1806_s3 + $0x60] sm:$0xff]  }
 0x12d   :  { %v288_v47 = vpack.c.bf16 %v286_v46, %v286_v46  ;;  %v1610_v46 = vld [vmem:[%s1806_s3 + $0x68] sm:$0xff]  }
 0x12f   :  { %527 = vmatprep.mubr.bf16.mxu1 %v288_v47  ;;  %v1611_v47 = vld [vmem:[%s1806_s3 + $0x28] sm:$0xff]  }
 0x130   :  { %528 = vmatmul.mubr.bf16.vlgmr.msra.gmra.mrb[0].mxu1 %v287_v48  ;;  %v1299_v48 = vld [vmem:[%s1805_s2 + $0x4] sm:$0x3] }
 0x131   :  { %998 = vmatpush1.bf16.msra.mxu1 %v1552_v53  ;;  %v579_v49 = vrot.slane %v1299_v48, %v1716_v34  ;;  %v583_v50 = vrot.slane %v1299_v48, %v1721_v36 }
 0x132   :  { %999 = vmatprep.subr.bf16.mxu1 %v1557_v55 }
 0x135   :  { %1000 = vmatpush1.bf16.msra.mxu1 %v1555_v56 }
 0x136   :  { %1001 = vmatprep.subr.bf16.mxu1 %v1560_v57 }
 0x139   :  { %1002 = vmatpush1.bf16.msra.mxu1 %v1558_v58 }
 0x13a   :  { %1003 = vmatprep.subr.bf16.mxu1 %v1563_v59 }
 0x13d   :  { %1004 = vmatpush1.bf16.msra.mxu1 %v1561_v60 }
 0x13e   :  { %1005 = vmatprep.subr.bf16.mxu1 %v1566_v61  ;;  %v1612_v61 = vld [vmem:[%s1806_s3 + $0x70] sm:$0xff]  }
 0x141   :  { %1006 = vmatpush1.bf16.msra.mxu1 %v1564_v62  ;;  %v1613_v62 = vld [vmem:[%s1806_s3 + $0x30] sm:$0xff]  }
 0x142   :  { %1007 = vmatprep.subr.bf16.mxu1 %v1569_v63  ;;  %v1614_v63 = vld [vmem:[%s1806_s3 + $0x78] sm:$0xff]  }
 0x145   :  { %1008 = vmatpush1.bf16.msra.mxu1 %v1567_v0  ;;  %v1615_v0 = vld [vmem:[%s1806_s3 + $0x38] sm:$0xff]  }
 0x146   :  { %1009 = vmatprep.subr.bf16.mxu1 %v1572_v1  ;;  %v1332_v1 = vld [vmem:[%s1805_s2 + $0x6] sm:$0x3]  ;;  %s1667_s2 = smov [#allocation5]  }
 0x147   :  { %s1225_s23 = sshll.u32 %s1667_s2, 4  ;;  %s1226_s23 = int_to_ptr.vmem [resolvable:$true] %s1225_s23 }
 0x148   :  { %s1638_s24 = scalar_lea.vmem %s1226_s23, 128  ;;  %p1643_p9 = scmp.lt.s32.totalorder %s1226_s23, %s1226_s23 }
 0x149   :  { %1010 = vmatpush1.bf16.msra.mxu1 %v1570_v2  ;;  %v830_v2 = vrot.slane %v1332_v1, %v1716_v34  ;;  %p1639_p8 = scmp.ne.s32.totalorder %s1226_s23, %s1638_s24  ;;  %p1644_p10 = scmp.lt.s32.totalorder %s1638_s24, %s1638_s24 }
 0x14a   :  { %1011 = vmatprep.subr.bf16.mxu1 %v1575_v3  ;;  %v834_v3 = vrot.slane %v1332_v1, %v1721_v36 }
 0x14b   :  { %p1645_p11 = por %p1644_p10, %p1643_p9 }
 0x14d   :  { %1012 = vmatpush1.bf16.msra.mxu1 %v1573_v4  ;;  %p1646_p12 = pnand %p1645_p11, %p1639_p8 }
 0x14e   :  { %1013 = vmatprep.subr.bf16.mxu1 %v1578_v5 }
 0x151   :  { %1014 = vmatpush1.bf16.msra.mxu1 %v1576_v6 }
 0x152   :  { %1015 = vmatprep.subr.bf16.mxu1 %v1581_v7 }
 0x155   :  { %1016 = vmatpush1.bf16.msra.mxu1 %v1579_v8 }
 0x156   :  { %1017 = vmatprep.subr.bf16.mxu1 %v1584_v9 }
 0x159   :  { %1018 = vmatpush1.bf16.msra.mxu1 %v1582_v10 }
 0x15a   :  { %1019 = vmatprep.subr.bf16.mxu1 %v1587_v11 }
 0x15d   :  { %1020 = vmatpush1.bf16.msra.mxu1 %v1585_v12 }
 0x15e   :  { %1021 = vmatprep.subr.bf16.mxu1 %v1590_v13 }
 0x161   :  { %1022 = vmatpush1.bf16.msra.mxu1 %v1588_v14 }
 0x162   :  { %1023 = vmatprep.subr.bf16.mxu1 %v1593_v15  ;;  %v1365_v15 = vld [vmem:[%s1807_s4] ss:$0 sm:$0xff] }
 0x165   :  { %1024 = vmatpush1.bf16.msra.mxu1 %v1591_v16 }
 0x166   :  { %1025 = vmatprep.subr.bf16.mxu1 %v1596_v30 }
 0x169   :  { %1026 = vmatpush1.bf16.msra.mxu1 %v1594_v31 }
 0x16a   :  { %1027 = vmatprep.subr.bf16.mxu1 %v1599_v32 }
 0x16d   :  { %1028 = vmatpush1.bf16.msra.mxu1 %v1597_v33 }
 0x203   :  { %v529_v20 = vpop.f32.mrb[0].mxu1 }
 0x204   :  { %v530_v21 = vadd.f32 %v529_v20, %v328_v18  ;;  %v531_v22 = vpop.f32.mrb[1].mxu1 }
 0x205   :  { %v532_v23 = vadd.f32 %v531_v22, %v332_v19  ;;  %v533_v24 = vpop.f32.mrb[2].mxu1 }
 0x206   :  { %v536_v25 = vmax.f32 %v530_v21, 0.0  ;;  %v534_v26 = vpop.f32.mrb[3].mxu1 }
 0x207   :  { %v537_v27 = vmax.f32 %v532_v23, 0.0 }
 0x208   :  { %v538_v29 = vpack.c.bf16 %v536_v25, %v536_v25 }
 0x209   :  { %v539_v28 = vpack.c.bf16 %v537_v27, %v537_v27 }
 0x20b   :  { %778 = vmatprep.mubr.bf16.mxu0 %v539_v28 }
 0x20c   :  { %779 = vmatmul.mubr.bf16.vlgmr.msra.gmra.mrb[4].mxu0 %v538_v29 }
 0x20d   :  { %1383 = vmatpush3.bf16.msra.mxu0 %v1601_v37 }
 0x20e   :  { %1384 = vmatprep.subr.bf16.mxu0 %v1602_v38 }
 0x211   :  { %1385 = vmatpush3.bf16.msra.mxu0 %v1603_v39 }
 0x212   :  { %1386 = vmatprep.subr.bf16.mxu0 %v1604_v40 }
 0x215   :  { %1387 = vmatpush3.bf16.msra.mxu0 %v1605_v41 }
 0x216   :  { %1388 = vmatprep.subr.bf16.mxu0 %v1606_v42 }
 0x219   :  { %1389 = vmatpush3.bf16.msra.mxu0 %v1607_v43 }
 0x21a   :  { %1390 = vmatprep.subr.bf16.mxu0 %v1608_v44 }
 0x21d   :  { %1391 = vmatpush3.bf16.msra.mxu0 %v1609_v45 }
 0x21e   :  { %1392 = vmatprep.subr.bf16.mxu0 %v1610_v46 }
 0x221   :  { %1393 = vmatpush3.bf16.msra.mxu0 %v1611_v47 }
 0x222   :  { %1394 = vmatprep.subr.bf16.mxu0 %v1612_v61 }
 0x225   :  { %1395 = vmatpush3.bf16.msra.mxu0 %v1613_v62 }
 0x226   :  { %1396 = vmatprep.subr.bf16.mxu0 %v1614_v63 }
 0x229   :  { %1397 = vmatpush3.bf16.msra.mxu0 %v1615_v0 }
 0x2df   :  { %v780_v51 = vpop.f32.mrb[4].mxu0 }
 0x2e0   :  { %v781_v52 = vadd.f32 %v780_v51, %v579_v49  ;;  %v782_v53 = vpop.f32.mrb[5].mxu0 }
 0x2e1   :  { %v783_v54 = vadd.f32 %v782_v53, %v583_v50  ;;  %v784_v55 = vpop.f32.mrb[6].mxu0 }
 0x2e2   :  { %v787_v56 = vmax.f32 %v781_v52, 0.0  ;;  %v785_v57 = vpop.f32.mrb[7].mxu0 }
 0x2e3   :  { %v788_v58 = vmax.f32 %v783_v54, 0.0 }
 0x2e4   :  { %v789_v60 = vpack.c.bf16 %v787_v56, %v787_v56 }
 0x2e5   :  { %v790_v59 = vpack.c.bf16 %v788_v58, %v788_v58 }
 0x2e7   :  { %1029 = vmatprep.mubr.bf16.mxu1 %v790_v59 }
 0x2e8   :  { %1030 = vmatmul.mubr.bf16.vlgmr.msra.gmra.mrb[4].mxu1 %v789_v60 }
 0x3bb   :  { %v1031_v4 = vpop.f32.mrb[4].mxu1 }
 0x3bc   :  { %v1032_v5 = vadd.f32 %v1031_v4, %v830_v2  ;;  %v1033_v6 = vpop.f32.mrb[5].mxu1 }
 0x3bd   :  { %v1034_v7 = vadd.f32 %v1033_v6, %v834_v3  ;;  %v1035_v8 = vpop.f32.mrb[6].mxu1 }
 0x3be   :  { %v1038_v9 = vmax.f32 %v1032_v5, 0.0  ;;  %v1036_v10 = vpop.f32.mrb[7].mxu1 }
 0x3bf   :  { %v1039_v11 = vmax.f32 %v1034_v7, 0.0 }
 0x3c0   :  { %v1040_v13 = vpack.c.bf16 %v1038_v9, %v1038_v9 }
 0x3c1   :  { %v1041_v12 = vpack.c.bf16 %v1039_v11, %v1039_v11 }
 0x3c3   :  { %1209 = vmatprep.mubr.bf16.mxu0 %v1041_v12 }
 0x3c4   :  { %1210 = vmatmul.mubr.bf16.vlgmr.msra.gmra.mrb[8].mxu0 %v1040_v13 }
 0x497   :  { %v1398_v14 = vpop.f32.mrb[8].mxu0 }
 0x498   :  { %v1399_v34 = vpop.f32.mrb[9].mxu0 }
 0x499   :  { %v1400_v36 = vadd.f32 %v1399_v34, %v1398_v14  ;;  %v1401_v16 = vpop.f32.mrb[10].mxu0 }
 0x49a   :  { %v1402_v17 = vpop.f32.mrb[11].mxu0 }
 0x49b   :  { %v1212_v18 = vadd.f32 %v1400_v36, %v1365_v15 }
 0x49d   :  { %1218 = vst.msk [vmem:[#allocation5] sm:$0xff] %vm1217_vm0, %v1212_v18 }
 0x49e   :  { %1649 = shalt.err (!%p1646_p12)
}
 0x49f   :  { %s1650_s4 = scalar_lea.hbm %s1808_s5, 128 }
 0x4a0   :  { %p1651_p13 = scmp.ne.s32.totalorder %s1808_s5, %s1650_s4  ;;  %p1654_p0 = scmp.lt.u32.totalorder %s1650_s4, %s1808_s5 }
 0x4a2   :  { %p1656_p1 = pnand %p1654_p0, %p1651_p13 }
 0x4a4   :  { %1659 = shalt.err (!%p1656_p1)
}
 0x4a5   :  { %1228 = dma.vmem_to_hbm [thread:$0]  %s1226_s23, 128, %s1808_s5, [#allocation4]  }
 0x4a6   :  { %1662 = dma.done.wait [#allocation4], 128  }
 0x4a7   :  { %1663 = vsyncadd [#allocation4], 4294967168 }
 0x4a8   :  { %1232 = vsyncpa [#allocation3], 1 }
 0x4a9   :  { %1233 = vsyncpa [#allocation4], 1 }

</bundles_post_ra>
